<compile_context>
chip_gen: v5e
topology: v5e:2x2
jax: 0.10.0
libtpu: 0.0.40
codegen_flags: <defaults>
</compile_context>

<pallas_src>
import functools

import jax
import jax.numpy as jnp
from jax import lax
from jax.experimental import pallas as pl
from jax.experimental.pallas import tpu as pltpu


def _fire_kernel(Cin, S, E, H, W, Q, PQ, NPQ, LPAD, count, eps,
                 x_ref, wsq_ref, wex_ref, pex_ref, o_ref, sbuf):
    f32 = jnp.float32

    # ---- halo mask (1, NPQ): 1.0 at real spatial positions, 0.0 on padding ----
    # float div/floor is exact for these small integers and always lowers on VPU.
    pos = lax.broadcasted_iota(jnp.int32, (1, NPQ), 1).astype(f32)
    img = jnp.floor(pos / PQ)
    q = pos - img * PQ
    row = jnp.floor(q / Q)
    col = q - row * Q
    m = jnp.where((row >= 1.0) & (row <= H) & (col >= 1.0) & (col <= W), 1.0, 0.0)

    inv_count = 1.0 / count

    def bn_train(y, g, b):
        # Single-pass training-mode BatchNorm (biased variance) over the
        # count = N*H*W real positions; halo positions are masked out of the stats.
        ym = y * m
        s1 = jnp.sum(ym, axis=1, keepdims=True)          # (C, 1)
        s2 = jnp.sum(ym * y, axis=1, keepdims=True)      # (C, 1)
        mean = s1 * inv_count
        var = s2 * inv_count - mean * mean
        scale = g * lax.rsqrt(var + eps)
        shift = b - mean * scale
        return y * scale + shift                         # one elementwise pass

    # ---- squeeze: 1x1 conv + bn1 + relu (weight & per-channel params packed) ----
    w1t = wsq_ref[:, 0:Cin]                   # (S, Cin)
    b1 = wsq_ref[:, Cin:Cin + 1]              # (S, 1)
    g1 = wsq_ref[:, Cin + 1:Cin + 2]
    be1 = wsq_ref[:, Cin + 2:Cin + 3]
    s = jnp.dot(w1t, x_ref[...], preferred_element_type=f32) + b1
    s = jnp.maximum(bn_train(s, g1, be1), 0.0)
    s = s * m                                 # zero halo == zero padding for the 3x3 taps

    # ---- stage s in a lane-padded scratch: zero ONLY the halo bands, then an
    #      aligned main store (LPAD is a multiple of 128). ----
    rpad = sbuf.shape[1] - LPAD - NPQ
    sbuf[:, 0:LPAD] = jnp.zeros((S, LPAD), f32)
    sbuf[:, LPAD + NPQ:LPAD + NPQ + rpad] = jnp.zeros((S, rpad), f32)
    sbuf[:, LPAD:LPAD + NPQ] = s

    # ---- fused expand: 1x1 folded into the center tap; one BN over 2E channels ----
    b_ex = pex_ref[:, 0:1]                    # (2E, 1) = concat(b2, b3)
    g_ex = pex_ref[:, 1:2]                    # concat(g2, g3)
    be_ex = pex_ref[:, 2:3]                   # concat(be2, be3)
    acc = jnp.zeros((2 * E, NPQ), f32) + b_ex
    for k in range(9):                        # static, fully unrolled
        off = LPAD + (k // 3 - 1) * Q + (k % 3 - 1)
        acc = acc + jnp.dot(wex_ref[k], sbuf[:, off:off + NPQ],
                            preferred_element_type=f32)
    o_ref[...] = jnp.maximum(bn_train(acc, g_ex, be_ex), 0.0)


def fire_forward(x_nchw, params):
    (w1, b1, g1, be1, w2, b2, g2, be2, w3_oihw, b3, g3, be3) = params
    N, Cin, H, W = x_nchw.shape
    S = w1.shape[1]
    E = w2.shape[1]
    P, Q = H + 2, W + 2
    NPQ = N * P * Q
    LPAD = 128                                 # lane-aligned leading halo band
    rpad = (-(LPAD + NPQ)) % 128               # pad total lanes to a multiple of 128
    if rpad < Q + 2:                           # need >= Q+1 lanes of trailing halo
        rpad += 128

    # NCHW -> zero-pad H/W by 1 -> (Cin, N*P*Q): channels on sublanes, spatial on lanes.
    x_pad = jnp.pad(x_nchw.astype(jnp.float32), ((0, 0), (0, 0), (1, 1), (1, 1)))
    xt = jnp.transpose(x_pad, (1, 0, 2, 3)).reshape(Cin, NPQ)

    # Squeeze weight + per-channel params packed into one (S, Cin+3) array.
    wsq = jnp.concatenate(
        [w1.T, b1[:, None], g1[:, None], be1[:, None]], axis=1).astype(jnp.float32)

    # Combined expand weight (9, 2E, S): every tap k carries w3[k]^T in rows [E:],
    # and the center tap (k == 4) additionally carries w2^T in rows [:E].
    w3t = jnp.transpose(w3_oihw, (2, 3, 0, 1)).reshape(9, E, S)      # (9, E, S)
    top = jnp.zeros((9, E, S), jnp.float32).at[4].set(w2.T)
    wex = jnp.concatenate([top, w3t], axis=1).astype(jnp.float32)    # (9, 2E, S)

    # Expand per-channel params (2E, 3): columns = (bias, gamma, beta).
    pex = jnp.stack([jnp.concatenate([b2, b3]),
                     jnp.concatenate([g2, g3]),
                     jnp.concatenate([be2, be3])], axis=1).astype(jnp.float32)

    kern = functools.partial(_fire_kernel, Cin, S, E, H, W, Q, P * Q, NPQ, LPAD,
                             float(N * H * W), 1e-5)
    vmem = pl.BlockSpec(memory_space=pltpu.MemorySpace.VMEM)

    # TODO(synk): at real SqueezeNet feature-map sizes this whole-batch-resident,
    # gridless design should get a row-tiled grid with partial BN stats (and a
    # "parallel" axis for v7x's two TensorCores / its 64 MiB VMEM budget).
    out_t = pl.pallas_call(
        kern,
        out_shape=jax.ShapeDtypeStruct((2 * E, NPQ), jnp.float32),
        in_specs=[vmem] * 4,
        out_specs=vmem,
        scratch_shapes=[pltpu.VMEM((S, LPAD + NPQ + rpad), jnp.float32)],
    )(xt, wsq, wex, pex)

    out = out_t.reshape(2 * E, N, P, Q)[:, :, 1:H + 1, 1:W + 1]
    return jnp.transpose(out, (1, 0, 2, 3))        # back to NCHW, like PyTorch


def fire_reference(x, w1, b1, g1, be1, w2, b2, g2, be2, w3_oihw, b3, g3, be3):
    """Plain-JAX reference mirroring the PyTorch module (training-mode BN)."""
    eps = 1e-5
    hp = lax.Precision.HIGHEST

    def bn(y, g, b):
        mu = jnp.mean(y, axis=(0, 2, 3), keepdims=True)
        var = jnp.mean((y - mu) ** 2, axis=(0, 2, 3), keepdims=True)
        return (y - mu) * lax.rsqrt(var + eps) * g.reshape(1, -1, 1, 1) + b.reshape(1, -1, 1, 1)

    s = jnp.einsum('nchw,cs->nshw', x, w1, precision=hp) + b1.reshape(1, -1, 1, 1)
    s = jax.nn.relu(bn(s, g1, be1))
    o1 = jnp.einsum('nshw,se->nehw', s, w2, precision=hp) + b2.reshape(1, -1, 1, 1)
    o1 = bn(o1, g2, be2)
    o2 = lax.conv_general_dilated(s, w3_oihw, (1, 1), ((1, 1), (1, 1)),
                                  dimension_numbers=('NCHW', 'OIHW', 'NCHW'),
                                  precision=hp) + b3.reshape(1, -1, 1, 1)
    o2 = bn(o2, g3, be3)
    return jax.nn.relu(jnp.concatenate([o1, o2], axis=1))


if __name__ == "__main__":
    # Fire(input_channels=16, squeeze_planes=8, expand_planes=16), x: (2, 16, 8, 8)
    N, Cin, S, E, H, W = 2, 16, 8, 16, 8, 8
    ks = jax.random.split(jax.random.PRNGKey(0), 14)

    x = jax.random.normal(ks[0], (N, Cin, H, W), jnp.float32)

    w1 = 0.2 * jax.random.normal(ks[1], (Cin, S), jnp.float32)       # conv1 (1x1)
    b1 = 0.1 * jax.random.normal(ks[2], (S,), jnp.float32)
    g1 = 1.0 + 0.2 * jax.random.normal(ks[3], (S,), jnp.float32)     # bn1
    be1 = 0.1 * jax.random.normal(ks[4], (S,), jnp.float32)

    w2 = 0.2 * jax.random.normal(ks[5], (S, E), jnp.float32)         # conv2 (1x1)
    b2 = 0.1 * jax.random.normal(ks[6], (E,), jnp.float32)
    g2 = 1.0 + 0.2 * jax.random.normal(ks[7], (E,), jnp.float32)     # bn2
    be2 = 0.1 * jax.random.normal(ks[8], (E,), jnp.float32)

    w3_oihw = 0.2 * jax.random.normal(ks[9], (E, S, 3, 3), jnp.float32)  # conv3 (3x3)
    b3 = 0.1 * jax.random.normal(ks[10], (E,), jnp.float32)
    g3 = 1.0 + 0.2 * jax.random.normal(ks[11], (E,), jnp.float32)    # bn3
    be3 = 0.1 * jax.random.normal(ks[12], (E,), jnp.float32)

    params = (w1, b1, g1, be1, w2, b2, g2, be2, w3_oihw, b3, g3, be3)
    out = jax.block_until_ready(fire_forward(x, params))

    ref = fire_reference(x, w1, b1, g1, be1, w2, b2, g2, be2, w3_oihw, b3, g3, be3)
    assert out.shape == (N, 2 * E, H, W), out.shape
    max_err = float(jnp.max(jnp.abs(out - ref)))
    if not bool(jnp.allclose(out, ref, rtol=2e-3, atol=2e-3)):
        raise AssertionError(f"Pallas output mismatch vs reference, max abs err = {max_err}")

    # TODO(synk): BatchNorm running_mean/running_var buffer updates (stateful
    # training side effect) are not modeled; only the forward output is produced.
    print("KERNEL_OK")
</pallas_src>

<mosaic_0001>
module attributes {stable_mosaic.version = 11 : i64} {
  func.func @_fire_kernel(%arg0: memref<16x200xf32, #tpu.memory_space<vmem>>, %arg1: memref<8x19xf32, #tpu.memory_space<vmem>>, %arg2: memref<9x32x8xf32, #tpu.memory_space<vmem>>, %arg3: memref<32x3xf32, #tpu.memory_space<vmem>>, %arg4: memref<32x200xf32, #tpu.memory_space<vmem>>, %arg5: memref<8x384xf32, #tpu.memory_space<vmem>>) attributes {dimension_semantics = [], scalar_prefetch = 0 : i64, scratch_operands = 1 : i64, tpu.core_type = #tpu.core_type<tc>} {
    %0 = tpu.iota {dimensions = array<i32: 1>} : vector<1x200xi32>
    %1 = arith.sitofp %0 : vector<1x200xi32> to vector<1x200xf32>
    %cst = arith.constant 1.000000e+02 : f32
    %2 = vector.broadcast %cst : f32 to vector<1x200xf32>
    %3 = arith.divf %1, %2 : vector<1x200xf32>
    %4 = math.floor %3 : vector<1x200xf32>
    %cst_0 = arith.constant 1.000000e+02 : f32
    %5 = vector.broadcast %cst_0 : f32 to vector<1x200xf32>
    %6 = arith.mulf %4, %5 : vector<1x200xf32>
    %7 = arith.subf %1, %6 : vector<1x200xf32>
    %cst_1 = arith.constant 1.000000e+01 : f32
    %8 = vector.broadcast %cst_1 : f32 to vector<1x200xf32>
    %9 = arith.divf %7, %8 : vector<1x200xf32>
    %10 = math.floor %9 : vector<1x200xf32>
    %cst_2 = arith.constant 1.000000e+01 : f32
    %11 = vector.broadcast %cst_2 : f32 to vector<1x200xf32>
    %12 = arith.mulf %10, %11 : vector<1x200xf32>
    %13 = arith.subf %7, %12 : vector<1x200xf32>
    %cst_3 = arith.constant 1.000000e+00 : f32
    %14 = vector.broadcast %cst_3 : f32 to vector<1x200xf32>
    %15 = arith.cmpf oge, %10, %14 : vector<1x200xf32>
    %cst_4 = arith.constant 8.000000e+00 : f32
    %16 = vector.broadcast %cst_4 : f32 to vector<1x200xf32>
    %17 = arith.cmpf ole, %10, %16 : vector<1x200xf32>
    %18 = arith.andi %15, %17 : vector<1x200xi1>
    %cst_5 = arith.constant 1.000000e+00 : f32
    %19 = vector.broadcast %cst_5 : f32 to vector<1x200xf32>
    %20 = arith.cmpf oge, %13, %19 : vector<1x200xf32>
    %21 = arith.andi %18, %20 : vector<1x200xi1>
    %cst_6 = arith.constant 8.000000e+00 : f32
    %22 = vector.broadcast %cst_6 : f32 to vector<1x200xf32>
    %23 = arith.cmpf ole, %13, %22 : vector<1x200xf32>
    %24 = arith.andi %21, %23 : vector<1x200xi1>
    %cst_7 = arith.constant 1.000000e+00 : f32
    %cst_8 = arith.constant 0.000000e+00 : f32
    %25 = vector.broadcast %cst_7 : f32 to vector<1x200xf32>
    %26 = vector.broadcast %cst_8 : f32 to vector<1x200xf32>
    %27 = arith.select %24, %25, %26 : vector<1x200xi1>, vector<1x200xf32>
    %c0 = arith.constant 0 : index
    %c0_9 = arith.constant 0 : index
    %28 = vector.load %arg1[%c0, %c0_9] : memref<8x19xf32, #tpu.memory_space<vmem>>, vector<8x16xf32>
    %c0_10 = arith.constant 0 : index
    %c16 = arith.constant 16 : index
    %29 = vector.load %arg1[%c0_10, %c16] : memref<8x19xf32, #tpu.memory_space<vmem>>, vector<8x1xf32>
    %c0_11 = arith.constant 0 : index
    %c17 = arith.constant 17 : index
    %30 = vector.load %arg1[%c0_11, %c17] : memref<8x19xf32, #tpu.memory_space<vmem>>, vector<8x1xf32>
    %c0_12 = arith.constant 0 : index
    %c18 = arith.constant 18 : index
    %31 = vector.load %arg1[%c0_12, %c18] : memref<8x19xf32, #tpu.memory_space<vmem>>, vector<8x1xf32>
    %c0_13 = arith.constant 0 : index
    %c0_14 = arith.constant 0 : index
    %32 = vector.load %arg0[%c0_13, %c0_14] : memref<16x200xf32, #tpu.memory_space<vmem>>, vector<16x200xf32>
    %cst_15 = arith.constant dense<0.000000e+00> : vector<8x200xf32>
    %33 = tpu.matmul %28, %32, %cst_15 {dimension_numbers = #tpu.dot_dimension_numbers<[1], [0], [0], [1], [0, 0, 1, 1], [], []>} : vector<8x16xf32>, vector<16x200xf32>, vector<8x200xf32> -> vector<8x200xf32>
    %34 = vector.broadcast %29 : vector<8x1xf32> to vector<8x200xf32>
    %35 = arith.addf %33, %34 : vector<8x200xf32>
    %36 = vector.broadcast %27 : vector<1x200xf32> to vector<8x200xf32>
    %37 = arith.mulf %35, %36 : vector<8x200xf32>
    %cst_16 = arith.constant dense<0.000000e+00> : vector<8xf32>
    %38 = vector.multi_reduction <add>, %37, %cst_16 [1] : vector<8x200xf32> to vector<8xf32>
    %39 = vector.shape_cast %38 : vector<8xf32> to vector<8x1xf32>
    %40 = arith.mulf %37, %35 : vector<8x200xf32>
    %cst_17 = arith.constant dense<0.000000e+00> : vector<8xf32>
    %41 = vector.multi_reduction <add>, %40, %cst_17 [1] : vector<8x200xf32> to vector<8xf32>
    %42 = vector.shape_cast %41 : vector<8xf32> to vector<8x1xf32>
    %cst_18 = arith.constant 7.812500e-03 : f32
    %43 = vector.broadcast %cst_18 : f32 to vector<8x1xf32>
    %44 = arith.mulf %39, %43 : vector<8x1xf32>
    %cst_19 = arith.constant 7.812500e-03 : f32
    %45 = vector.broadcast %cst_19 : f32 to vector<8x1xf32>
    %46 = arith.mulf %42, %45 : vector<8x1xf32>
    %47 = arith.mulf %44, %44 : vector<8x1xf32>
    %48 = arith.subf %46, %47 : vector<8x1xf32>
    %cst_20 = arith.constant 9.99999974E-6 : f32
    %49 = vector.broadcast %cst_20 : f32 to vector<8x1xf32>
    %50 = arith.addf %48, %49 : vector<8x1xf32>
    %51 = math.rsqrt %50 : vector<8x1xf32>
    %52 = arith.mulf %30, %51 : vector<8x1xf32>
    %53 = arith.mulf %44, %52 : vector<8x1xf32>
    %54 = arith.subf %31, %53 : vector<8x1xf32>
    %55 = vector.broadcast %52 : vector<8x1xf32> to vector<8x200xf32>
    %56 = arith.mulf %35, %55 : vector<8x200xf32>
    %57 = vector.broadcast %54 : vector<8x1xf32> to vector<8x200xf32>
    %58 = arith.addf %56, %57 : vector<8x200xf32>
    %cst_21 = arith.constant 0.000000e+00 : f32
    %59 = vector.broadcast %cst_21 : f32 to vector<8x200xf32>
    %60 = arith.maximumf %58, %59 : vector<8x200xf32>
    %61 = vector.broadcast %27 : vector<1x200xf32> to vector<8x200xf32>
    %62 = arith.mulf %60, %61 : vector<8x200xf32>
    %cst_22 = arith.constant 0.000000e+00 : f32
    %63 = vector.broadcast %cst_22 : f32 to vector<8x128xf32>
    %c0_23 = arith.constant 0 : index
    %c0_24 = arith.constant 0 : index
    %64 = vector.load %arg5[%c0_23, %c0_24] : memref<8x384xf32, #tpu.memory_space<vmem>>, vector<8x128xf32>
    tpu.vector_store %arg5[%c0_23, %c0_24], %63 {strides = array<i32>} : memref<8x384xf32, #tpu.memory_space<vmem>>, vector<8x128xf32>,
    %cst_25 = arith.constant 0.000000e+00 : f32
    %65 = vector.broadcast %cst_25 : f32 to vector<8x56xf32>
    %c0_26 = arith.constant 0 : index
    %c328 = arith.constant 328 : index
    %66 = vector.load %arg5[%c0_26, %c328] : memref<8x384xf32, #tpu.memory_space<vmem>>, vector<8x56xf32>
    tpu.vector_store %arg5[%c0_26, %c328], %65 {strides = array<i32>} : memref<8x384xf32, #tpu.memory_space<vmem>>, vector<8x56xf32>,
    %c0_27 = arith.constant 0 : index
    %c128 = arith.constant 128 : index
    %67 = vector.load %arg5[%c0_27, %c128] : memref<8x384xf32, #tpu.memory_space<vmem>>, vector<8x200xf32>
    tpu.vector_store %arg5[%c0_27, %c128], %62 {strides = array<i32>} : memref<8x384xf32, #tpu.memory_space<vmem>>, vector<8x200xf32>,
    %c0_28 = arith.constant 0 : index
    %c0_29 = arith.constant 0 : index
    %68 = vector.load %arg3[%c0_28, %c0_29] : memref<32x3xf32, #tpu.memory_space<vmem>>, vector<32x1xf32>
    %c0_30 = arith.constant 0 : index
    %c1 = arith.constant 1 : index
    %69 = vector.load %arg3[%c0_30, %c1] : memref<32x3xf32, #tpu.memory_space<vmem>>, vector<32x1xf32>
    %c0_31 = arith.constant 0 : index
    %c2 = arith.constant 2 : index
    %70 = vector.load %arg3[%c0_31, %c2] : memref<32x3xf32, #tpu.memory_space<vmem>>, vector<32x1xf32>
    %cst_32 = arith.constant 0.000000e+00 : f32
    %71 = vector.broadcast %cst_32 : f32 to vector<32x200xf32>
    %72 = vector.broadcast %68 : vector<32x1xf32> to vector<32x200xf32>
    %73 = arith.addf %71, %72 : vector<32x200xf32>
    %c0_33 = arith.constant 0 : index
    %c0_34 = arith.constant 0 : index
    %c0_35 = arith.constant 0 : index
    %74 = vector.load %arg2[%c0_33, %c0_34, %c0_35] : memref<9x32x8xf32, #tpu.memory_space<vmem>>, vector<1x32x8xf32>
    %75 = vector.shape_cast %74 : vector<1x32x8xf32> to vector<32x8xf32>
    %c0_36 = arith.constant 0 : index
    %c117 = arith.constant 117 : index
    %76 = vector.load %arg5[%c0_36, %c117] : memref<8x384xf32, #tpu.memory_space<vmem>>, vector<8x200xf32>
    %cst_37 = arith.constant dense<0.000000e+00> : vector<32x200xf32>
    %77 = tpu.matmul %75, %76, %cst_37 {dimension_numbers = #tpu.dot_dimension_numbers<[1], [0], [0], [1], [0, 0, 1, 1], [], []>} : vector<32x8xf32>, vector<8x200xf32>, vector<32x200xf32> -> vector<32x200xf32>
    %78 = arith.addf %73, %77 : vector<32x200xf32>
    %c1_38 = arith.constant 1 : index
    %c0_39 = arith.constant 0 : index
    %c0_40 = arith.constant 0 : index
    %79 = vector.load %arg2[%c1_38, %c0_39, %c0_40] : memref<9x32x8xf32, #tpu.memory_space<vmem>>, vector<1x32x8xf32>
    %80 = vector.shape_cast %79 : vector<1x32x8xf32> to vector<32x8xf32>
    %c0_41 = arith.constant 0 : index
    %c118 = arith.constant 118 : index
    %81 = vector.load %arg5[%c0_41, %c118] : memref<8x384xf32, #tpu.memory_space<vmem>>, vector<8x200xf32>
    %cst_42 = arith.constant dense<0.000000e+00> : vector<32x200xf32>
    %82 = tpu.matmul %80, %81, %cst_42 {dimension_numbers = #tpu.dot_dimension_numbers<[1], [0], [0], [1], [0, 0, 1, 1], [], []>} : vector<32x8xf32>, vector<8x200xf32>, vector<32x200xf32> -> vector<32x200xf32>
    %83 = arith.addf %78, %82 : vector<32x200xf32>
    %c2_43 = arith.constant 2 : index
    %c0_44 = arith.constant 0 : index
    %c0_45 = arith.constant 0 : index
    %84 = vector.load %arg2[%c2_43, %c0_44, %c0_45] : memref<9x32x8xf32, #tpu.memory_space<vmem>>, vector<1x32x8xf32>
    %85 = vector.shape_cast %84 : vector<1x32x8xf32> to vector<32x8xf32>
    %c0_46 = arith.constant 0 : index
    %c119 = arith.constant 119 : index
    %86 = vector.load %arg5[%c0_46, %c119] : memref<8x384xf32, #tpu.memory_space<vmem>>, vector<8x200xf32>
    %cst_47 = arith.constant dense<0.000000e+00> : vector<32x200xf32>
    %87 = tpu.matmul %85, %86, %cst_47 {dimension_numbers = #tpu.dot_dimension_numbers<[1], [0], [0], [1], [0, 0, 1, 1], [], []>} : vector<32x8xf32>, vector<8x200xf32>, vector<32x200xf32> -> vector<32x200xf32>
    %88 = arith.addf %83, %87 : vector<32x200xf32>
    %c3 = arith.constant 3 : index
    %c0_48 = arith.constant 0 : index
    %c0_49 = arith.constant 0 : index
    %89 = vector.load %arg2[%c3, %c0_48, %c0_49] : memref<9x32x8xf32, #tpu.memory_space<vmem>>, vector<1x32x8xf32>
    %90 = vector.shape_cast %89 : vector<1x32x8xf32> to vector<32x8xf32>
    %c0_50 = arith.constant 0 : index
    %c127 = arith.constant 127 : index
    %91 = vector.load %arg5[%c0_50, %c127] : memref<8x384xf32, #tpu.memory_space<vmem>>, vector<8x200xf32>
    %cst_51 = arith.constant dense<0.000000e+00> : vector<32x200xf32>
    %92 = tpu.matmul %90, %91, %cst_51 {dimension_numbers = #tpu.dot_dimension_numbers<[1], [0], [0], [1], [0, 0, 1, 1], [], []>} : vector<32x8xf32>, vector<8x200xf32>, vector<32x200xf32> -> vector<32x200xf32>
    %93 = arith.addf %88, %92 : vector<32x200xf32>
    %c4 = arith.constant 4 : index
    %c0_52 = arith.constant 0 : index
    %c0_53 = arith.constant 0 : index
    %94 = vector.load %arg2[%c4, %c0_52, %c0_53] : memref<9x32x8xf32, #tpu.memory_space<vmem>>, vector<1x32x8xf32>
    %95 = vector.shape_cast %94 : vector<1x32x8xf32> to vector<32x8xf32>
    %c0_54 = arith.constant 0 : index
    %c128_55 = arith.constant 128 : index
    %96 = vector.load %arg5[%c0_54, %c128_55] : memref<8x384xf32, #tpu.memory_space<vmem>>, vector<8x200xf32>
    %cst_56 = arith.constant dense<0.000000e+00> : vector<32x200xf32>
    %97 = tpu.matmul %95, %96, %cst_56 {dimension_numbers = #tpu.dot_dimension_numbers<[1], [0], [0], [1], [0, 0, 1, 1], [], []>} : vector<32x8xf32>, vector<8x200xf32>, vector<32x200xf32> -> vector<32x200xf32>
    %98 = arith.addf %93, %97 : vector<32x200xf32>
    %c5 = arith.constant 5 : index
    %c0_57 = arith.constant 0 : index
    %c0_58 = arith.constant 0 : index
    %99 = vector.load %arg2[%c5, %c0_57, %c0_58] : memref<9x32x8xf32, #tpu.memory_space<vmem>>, vector<1x32x8xf32>
    %100 = vector.shape_cast %99 : vector<1x32x8xf32> to vector<32x8xf32>
    %c0_59 = arith.constant 0 : index
    %c129 = arith.constant 129 : index
    %101 = vector.load %arg5[%c0_59, %c129] : memref<8x384xf32, #tpu.memory_space<vmem>>, vector<8x200xf32>
    %cst_60 = arith.constant dense<0.000000e+00> : vector<32x200xf32>
    %102 = tpu.matmul %100, %101, %cst_60 {dimension_numbers = #tpu.dot_dimension_numbers<[1], [0], [0], [1], [0, 0, 1, 1], [], []>} : vector<32x8xf32>, vector<8x200xf32>, vector<32x200xf32> -> vector<32x200xf32>
    %103 = arith.addf %98, %102 : vector<32x200xf32>
    %c6 = arith.constant 6 : index
    %c0_61 = arith.constant 0 : index
    %c0_62 = arith.constant 0 : index
    %104 = vector.load %arg2[%c6, %c0_61, %c0_62] : memref<9x32x8xf32, #tpu.memory_space<vmem>>, vector<1x32x8xf32>
    %105 = vector.shape_cast %104 : vector<1x32x8xf32> to vector<32x8xf32>
    %c0_63 = arith.constant 0 : index
    %c137 = arith.constant 137 : index
    %106 = vector.load %arg5[%c0_63, %c137] : memref<8x384xf32, #tpu.memory_space<vmem>>, vector<8x200xf32>
    %cst_64 = arith.constant dense<0.000000e+00> : vector<32x200xf32>
    %107 = tpu.matmul %105, %106, %cst_64 {dimension_numbers = #tpu.dot_dimension_numbers<[1], [0], [0], [1], [0, 0, 1, 1], [], []>} : vector<32x8xf32>, vector<8x200xf32>, vector<32x200xf32> -> vector<32x200xf32>
    %108 = arith.addf %103, %107 : vector<32x200xf32>
    %c7 = arith.constant 7 : index
    %c0_65 = arith.constant 0 : index
    %c0_66 = arith.constant 0 : index
    %109 = vector.load %arg2[%c7, %c0_65, %c0_66] : memref<9x32x8xf32, #tpu.memory_space<vmem>>, vector<1x32x8xf32>
    %110 = vector.shape_cast %109 : vector<1x32x8xf32> to vector<32x8xf32>
    %c0_67 = arith.constant 0 : index
    %c138 = arith.constant 138 : index
    %111 = vector.load %arg5[%c0_67, %c138] : memref<8x384xf32, #tpu.memory_space<vmem>>, vector<8x200xf32>
    %cst_68 = arith.constant dense<0.000000e+00> : vector<32x200xf32>
    %112 = tpu.matmul %110, %111, %cst_68 {dimension_numbers = #tpu.dot_dimension_numbers<[1], [0], [0], [1], [0, 0, 1, 1], [], []>} : vector<32x8xf32>, vector<8x200xf32>, vector<32x200xf32> -> vector<32x200xf32>
    %113 = arith.addf %108, %112 : vector<32x200xf32>
    %c8 = arith.constant 8 : index
    %c0_69 = arith.constant 0 : index
    %c0_70 = arith.constant 0 : index
    %114 = vector.load %arg2[%c8, %c0_69, %c0_70] : memref<9x32x8xf32, #tpu.memory_space<vmem>>, vector<1x32x8xf32>
    %115 = vector.shape_cast %114 : vector<1x32x8xf32> to vector<32x8xf32>
    %c0_71 = arith.constant 0 : index
    %c139 = arith.constant 139 : index
    %116 = vector.load %arg5[%c0_71, %c139] : memref<8x384xf32, #tpu.memory_space<vmem>>, vector<8x200xf32>
    %cst_72 = arith.constant dense<0.000000e+00> : vector<32x200xf32>
    %117 = tpu.matmul %115, %116, %cst_72 {dimension_numbers = #tpu.dot_dimension_numbers<[1], [0], [0], [1], [0, 0, 1, 1], [], []>} : vector<32x8xf32>, vector<8x200xf32>, vector<32x200xf32> -> vector<32x200xf32>
    %118 = arith.addf %113, %117 : vector<32x200xf32>
    %119 = vector.broadcast %27 : vector<1x200xf32> to vector<32x200xf32>
    %120 = arith.mulf %118, %119 : vector<32x200xf32>
    %cst_73 = arith.constant dense<0.000000e+00> : vector<32xf32>
    %121 = vector.multi_reduction <add>, %120, %cst_73 [1] : vector<32x200xf32> to vector<32xf32>
    %122 = vector.shape_cast %121 : vector<32xf32> to vector<32x1xf32>
    %123 = arith.mulf %120, %118 : vector<32x200xf32>
    %cst_74 = arith.constant dense<0.000000e+00> : vector<32xf32>
    %124 = vector.multi_reduction <add>, %123, %cst_74 [1] : vector<32x200xf32> to vector<32xf32>
    %125 = vector.shape_cast %124 : vector<32xf32> to vector<32x1xf32>
    %cst_75 = arith.constant 7.812500e-03 : f32
    %126 = vector.broadcast %cst_75 : f32 to vector<32x1xf32>
    %127 = arith.mulf %122, %126 : vector<32x1xf32>
    %cst_76 = arith.constant 7.812500e-03 : f32
    %128 = vector.broadcast %cst_76 : f32 to vector<32x1xf32>
    %129 = arith.mulf %125, %128 : vector<32x1xf32>
    %130 = arith.mulf %127, %127 : vector<32x1xf32>
    %131 = arith.subf %129, %130 : vector<32x1xf32>
    %cst_77 = arith.constant 9.99999974E-6 : f32
    %132 = vector.broadcast %cst_77 : f32 to vector<32x1xf32>
    %133 = arith.addf %131, %132 : vector<32x1xf32>
    %134 = math.rsqrt %133 : vector<32x1xf32>
    %135 = arith.mulf %69, %134 : vector<32x1xf32>
    %136 = arith.mulf %127, %135 : vector<32x1xf32>
    %137 = arith.subf %70, %136 : vector<32x1xf32>
    %138 = vector.broadcast %135 : vector<32x1xf32> to vector<32x200xf32>
    %139 = arith.mulf %118, %138 : vector<32x200xf32>
    %140 = vector.broadcast %137 : vector<32x1xf32> to vector<32x200xf32>
    %141 = arith.addf %139, %140 : vector<32x200xf32>
    %cst_78 = arith.constant 0.000000e+00 : f32
    %142 = vector.broadcast %cst_78 : f32 to vector<32x200xf32>
    %143 = arith.maximumf %141, %142 : vector<32x200xf32>
    %c0_79 = arith.constant 0 : index
    %c0_80 = arith.constant 0 : index
    %144 = vector.load %arg4[%c0_79, %c0_80] : memref<32x200xf32, #tpu.memory_space<vmem>>, vector<32x200xf32>
    tpu.vector_store %arg4[%c0_79, %c0_80], %143 {strides = array<i32>} : memref<32x200xf32, #tpu.memory_space<vmem>>, vector<32x200xf32>,
    return
  }
}

</mosaic_0001>

<bundles_post_ra>
// kernel: tpu_custom_call.1
= control target key start
LH: loop header
LB: loop body
LE: loop exit
PB: predicated region body
PF: predicated region fallthrough
CT: control target
= control target key end

     0   :  { %vm79_vm0 = vcmask 130048   ;;  %s1905_s0 = inlined_call_operand.vmem [shape: f32[16,200], index: 0, kind: input, shape index: {}]   ;;  %s1906_s1 = inlined_call_operand.vmem [shape: f32[8,19], index: 1, kind: input, shape index: {}]   ;;  %s1907_s2 = inlined_call_operand.vmem [shape: f32[9,32,8], index: 2, kind: input, shape index: {}]   ;;  %s1908_s3 = inlined_call_operand.vmem [shape: f32[32,3], index: 3, kind: input, shape index: {}]   ;;  %s1909_s4 = inlined_call_operand.hbm [shape: f32[32,200], index: 4, kind: output, shape index: {}]  }
   0x1   :  { %v72_v0 = vld [vmem:[%s1905_s0 + $0x10] sm:$0xff]  ;;  %v73_v1 = vld [vmem:[%s1905_s0 + $0x18] sm:$0xff]  ;;  %v70_v2 = vld [vmem:[%s1905_s0] sm:$0xff] }
   0x2   :  { %96 = vmatpush.msra.mxu0 %v72_v0  ;;  %116 = vmatpush.msra.mxu1 %v73_v1  ;;  %v71_v3 = vld [vmem:[%s1905_s0 + $0x8] sm:$0xff]  ;;  %v1543_v4 = vld [vmem:[%s1906_s1] sm:$0xff] }
   0x3   :  { %9 = vsyncpa [#allocation4], 0  ;;  %v1483_v5 = vmov 16   ;;  %v1484_v6 = vmov 100.0   ;;  %v18_v9 = vlaneseq  ;;  %v1485_v11 = vmov 10.0   ;;  %s1488_s0 = smov 1  }
   0x4   :  { %1391 = vset.pattern.permute.xlu0 %v1483_v5  ;;  %97 = vmatpush.msra.mxu0 %v70_v2  ;;  %1443 = vrcp.f32 %v1484_v6  ;;  %v1486_v44 = vmov 0.0   ;;  %v1487_v57 = vmov 17   ;;  %s1489_s1 = smov 9   ;;  %s1490_s25 = smov 10  }
   0x5   :  { %117 = vmatpush.msra.mxu1 %v71_v3  ;;  %1263 = vmatmul.msk.f32.vlgmr.msra.gmra.mxu0 %vm79_vm0, %v1543_v4  ;;  %1445 = vrcp.f32 %v1485_v11  ;;  %v19_v12 = vand.u32 127, %v18_v9  ;;  %v1491_v11 = vmov 18   ;;  %s1492_s26 = smov 117   ;;  %s1493_s27 = smov 119  }
   0x6   :  { %1264 = vmatmul.msk.f32.vlgmr.msra.gmra.mxu1 %vm79_vm0, %v1543_v4  ;;  %76 = vperm.xlu0 %1391, %v1543_v4   ;;  %s1494_s28 = smov 11   ;;  %s1495_s29 = smov 127  }
   0x7   :  { %v20_v14 = vadd.s32 128, %v19_v12  ;;  %v21_v17 = vcvt.s32.f32 %v19_v12  ;;  %1392 = vset.pattern.permute.xlu2 %v1487_v57  ;;  %s1496_s30 = smov 118   ;;  %v1624_v57 = vld [vmem:[%s1908_s3 + $0x10] sm:$0xff]  ;;  %s1502_s5 = smov 16  }
   0x9   :  { %v22_v18 = vcvt.s32.f32 %v20_v14 }
   0xa   :  { %v1444_v7 = vpop.eup %1443 }
   0xb   :  { %v24_v8 = vmul.f32 100.0, %v1444_v7  ;;  %v1446_v16 = vpop.eup %1445  ;;  %vm28_vm1 = vweird.f32 %v1444_v7 }
   0xc   :  { %v39_v20 = vmul.f32 10.0, %v1446_v16  ;;  %vm43_vm2 = vweird.f32 %v1446_v16 }
   0xd   :  { %v25_v10 = vsub.f32 1.0, %v24_v8 }
   0xe   :  { %v40_v23 = vsub.f32 1.0, %v39_v20 }
   0xf   :  { %v26_v13 = vmul.f32 %v1444_v7, %v25_v10 }
  0x10   :  { %v41_v26 = vmul.f32 %v1446_v16, %v40_v23 }
  0x11   :  { %v27_v15 = vadd.f32 %v1444_v7, %v26_v13 }
  0x12   :  { %v42_v29 = vadd.f32 %v1446_v16, %v41_v26  ;;  %v1578_v26 = vld [vmem:[%s1908_s3 + $0x8] sm:$0xff] }
  0x13   :  { %v29_v19 = vsel %vm28_vm1, %v1444_v7, %v27_v15  ;;  %vm124_vm1 = vcmask 588800  }
  0x14   :  { %v30_v21 = vmul.f32 %v29_v19, %v21_v17  ;;  %v31_v22 = vmul.f32 %v29_v19, %v22_v18  ;;  %v44_v32 = vsel %vm43_vm2, %v1446_v16, %v42_v29 }
  0x16   :  { %v32_v24 = vfloor.f32 %v30_v21  ;;  %v33_v25 = vfloor.f32 %v31_v22 }
  0x18   :  { %v34_v27 = vmul.f32 100.0, %v32_v24  ;;  %v35_v28 = vmul.f32 100.0, %v33_v25 }
  0x1a   :  { %v36_v30 = vsub.f32 %v21_v17, %v34_v27  ;;  %v37_v31 = vsub.f32 %v22_v18, %v35_v28 }
  0x1c   :  { %v45_v33 = vmul.f32 %v44_v32, %v36_v30  ;;  %v46_v34 = vmul.f32 %v44_v32, %v37_v31 }
  0x1e   :  { %v47_v35 = vfloor.f32 %v45_v33  ;;  %v48_v36 = vfloor.f32 %v46_v34  ;;  %v1590_v33 = vld [vmem:[%s1908_s3] sm:$0xff] }
  0x20   :  { %v49_v37 = vmul.f32 10.0, %v47_v35  ;;  %v50_v38 = vmul.f32 10.0, %v48_v36  ;;  %vm53_vm3 = vcmp.ge.f32.partialorder %v47_v35, 1.0  ;;  %vm55_vm4 = vcmp.le.f32.partialorder %v47_v35, 8.0 }
  0x21   :  { %vm54_vm5 = vcmp.ge.f32.partialorder %v48_v36, 1.0  ;;  %vm56_vm6 = vcmp.le.f32.partialorder %v48_v36, 8.0  ;;  %vm57_vm7 = vmand %vm53_vm3, %vm55_vm4  ;;  %v210_v36 = vld [vmem:[%s1907_s2 + $0x10] sm:$0xff] }
  0x22   :  { %v51_v39 = vsub.f32 %v36_v30, %v49_v37  ;;  %v52_v40 = vsub.f32 %v37_v31, %v50_v38  ;;  %vm58_vm9 = vmand %vm54_vm5, %vm56_vm6  ;;  %vm176_vm5 = vcmask 1048128   ;;  %vm224_vm6 = vcmask 89088   ;;  %v209_v30 = vld [vmem:[%s1907_s2 + $0x8] sm:$0xff]  ;;  %v208_v31 = vld [vmem:[%s1907_s2] sm:$0xff] }
  0x23   :  { %177 = vst.msk [vmem:[#allocation2 + $0x10] sm:$0xff] %vm176_vm5, %v1486_v44  ;;  %v1603_v37 = vld [vmem:[%s1908_s3 + $0x18] sm:$0xff] }
  0x24   :  { %vm59_vm8 = vcmp.ge.f32.partialorder %v51_v39, 1.0  ;;  %vm60_vm10 = vcmp.ge.f32.partialorder %v52_v40, 1.0  ;;  %vm63_vm12 = vcmp.le.f32.partialorder %v51_v39, 8.0  ;;  %vm64_vm14 = vcmp.le.f32.partialorder %v52_v40, 8.0 }
  0x25   :  { %vm61_vm11 = vmand %vm57_vm7, %vm59_vm8  ;;  %vm229_vm7 = vcmask 64512   ;;  %vm413_vm8 = vcmask 72704  }
  0x26   :  { %vm62_vm13 = vmand %vm58_vm9, %vm60_vm10  ;;  %vm319_vm9 = vcmask 80896   ;;  %vm773_vm10 = vcmask 973824  }
  0x27   :  { %vm65_vm15 = vmand %vm61_vm11, %vm63_vm12  ;;  %vm507_vm11 = vcmask 7168   ;;  %vm682_vm12 = vcmask 1039360  }
  0x28   :  { %vm66_vm0 = vmand %vm62_vm13, %vm64_vm14  ;;  %v1549_v45 = vsel %vm65_vm15, 1.0, %v1486_v44  ;;  %vm864_vm13 = vcmask 965632   ;;  %vm955_vm14 = vcmask 957440  }
  0x29   :  { %v1552_v46 = vsel %vm66_vm0, 1.0, %v1486_v44 }
  0x78   :  { %v77_v41 = vpop.permute.xlu0 %76 }
  0x82   :  { %v99_v42 = vpop.f32.mrf.mxu0 }
  0x83   :  { %v119_v43 = vpop.f32.mrf.mxu1  ;;  %v100_v47 = vadd.f32 %v99_v42, %v77_v41  ;;  %v211_v42 = vld [vmem:[%s1907_s2 + $0x18] sm:$0xff] }
  0x84   :  { %v120_v48 = vadd.f32 %v119_v43, %v77_v41 }
  0x85   :  { %v122_v49 = vmul.f32 %v100_v47, %v1549_v45 }
  0x86   :  { %v123_v50 = vmul.f32 %v120_v48, %v1552_v46 }
  0x87   :  { %v129_v52 = vmul.f32 %v122_v49, %v100_v47 }
  0x88   :  { %v125_v51 = vsel %vm124_vm1, %v123_v50, 0.0  ;;  %v130_v53 = vmul.f32 %v123_v50, %v120_v48 }
  0x89   :  { %v126_v54 = vadd.f32 %v125_v51, %v122_v49 }
  0x8a   :  { %v131_v55 = vsel %vm124_vm1, %v130_v53, 0.0 }
  0x8b   :  { %127 = vadd.xlane.f32.xlu0 %v126_v54  ;;  %v132_v56 = vadd.f32 %v131_v55, %v129_v52  ;;  %v1273_v52 = vld [vmem:[%s1907_s2 + $0x20] sm:$0xff] }
  0x8c   :  { %v1285_v55 = vld [vmem:[%s1907_s2 + $0x40] sm:$0xff] }
  0x8d   :  { %133 = vadd.xlane.f32.xlu1 %v132_v56 }
  0xfe   :  { %v128_v58 = vpop.xlane.xlu0 %127 }
  0xff   :  { %v135_v59 = vmul.f32 0.0078125, %v128_v58 }
 0x100   :  { %v134_v60 = vpop.xlane.xlu1 %133 }
 0x101   :  { %v137_v61 = vmul.f32 %v135_v59, %v135_v59  ;;  %v136_v62 = vmul.f32 0.0078125, %v134_v60 }
 0x103   :  { %v138_v63 = vsub.f32 %v136_v62, %v137_v61 }
 0x105   :  { %v139_v0 = vadd.f32 1e-05, %v138_v63  ;;  %v1274_v63 = vld [vmem:[%s1907_s2 + $0x28] sm:$0xff] }
 0x107   :  { %1447 = vrsqrt.f32 %v139_v0  ;;  %vm146_vm3 = vweird.f32 %v139_v0 }
 0x10d   :  { %v1448_v1 = vpop.eup %1447 }
 0x10e   :  { %v141_v2 = vmul.f32 %v1448_v1, %v139_v0  ;;  %vm147_vm2 = vweird.f32 %v1448_v1 }
 0x10f   :  { %vm148_vm4 = vmor %vm146_vm3, %vm147_vm2 }
 0x110   :  { %v142_v3 = vmul.f32 %v1448_v1, %v141_v2 }
 0x112   :  { %v143_v5 = vmul.f32 0.5, %v142_v3  ;;  %v1286_v3 = vld [vmem:[%s1907_s2 + $0x48] sm:$0xff] }
 0x114   :  { %v144_v6 = vsub.f32 1.5, %v143_v5 }
 0x116   :  { %v145_v7 = vmul.f32 %v1448_v1, %v144_v6 }
 0x118   :  { %v149_v8 = vsel %vm148_vm4, %v1448_v1, %v145_v7 }
 0x119   :  { %v150_v9 = vmul.f32 %v149_v8, %v1543_v4  ;;  %v1275_v8 = vld [vmem:[%s1907_s2 + $0x30] sm:$0xff] }
 0x11b   :  { %159 = vperm.xlu2 %1392, %v150_v9   ;;  %v151_v10 = vmul.f32 %v150_v9, %v135_v59 }
 0x11d   :  { %153 = vrot.lane.b32.xlu1 %v151_v10, %s1488_s0  ;;  %v1287_v10 = vld [vmem:[%s1907_s2 + $0x50] sm:$0xff] }
 0x123   :  { %1393 = vset.pattern.permute.xlu2 %v1491_v11  ;;  %v1276_v11 = vld [vmem:[%s1907_s2 + $0x38] sm:$0xff] }
 0x125   :  { %407 = vrot.lane.b32.xlu1 %v1486_v44, %s1489_s1 }
 0x12d   :  { %313 = vrot.lane.b32.xlu1 %v1486_v44, %s1490_s25 }
 0x135   :  { %501 = vrot.lane.b32.xlu1 %v1486_v44, %s1488_s0 }
 0x175   :  { %v160_v14 = vpop.permute.xlu2 %159 }
 0x176   :  { %v162_v15 = vmul.f32 %v160_v14, %v100_v47  ;;  %v163_v16 = vmul.f32 %v160_v14, %v120_v48 }
 0x18f   :  { %v154_v12 = vpop.permute.xlu1 %153 }
 0x190   :  { %v156_v13 = vsub.f32 %v1543_v4, %v154_v12  ;;  %v1497_v4 = vmov 0   ;;  %v1288_v12 = vld [vmem:[%s1907_s2 + $0x58] sm:$0xff] }
 0x191   :  { %1435 = vset.pattern.permute.xlu0 %v1497_v4  ;;  %1434 = vset.pattern.permute.xlu1 %v1497_v4 }
 0x192   :  { %166 = vperm.xlu2 %1393, %v156_v13  }
 0x197   :  { %v408_v38 = vpop.permute.xlu1 %407 }
 0x19a   :  { %1436 = vset.pattern.permute.xlu2 %v1497_v4  ;;  %v1311_v4 = vld [vmem:[%s1907_s2 + $0x90] sm:$0xff] }
 0x19f   :  { %v314_v47 = vpop.permute.xlu1 %313 }
 0x1a7   :  { %v502_v62 = vpop.permute.xlu1 %501 }
 0x1ec   :  { %v167_v17 = vpop.permute.xlu2 %166 }
 0x1ed   :  { %v169_v18 = vadd.f32 %v167_v17, %v162_v15  ;;  %v170_v19 = vadd.f32 %v167_v17, %v163_v16  ;;  %v1297_v16 = vld [vmem:[%s1907_s2 + $0x60] sm:$0xff] }
 0x1ef   :  { %v171_v20 = vmax.f32 %v169_v18, 0.0  ;;  %v172_v21 = vmax.f32 %v170_v19, 0.0  ;;  %v1309_v18 = vld [vmem:[%s1907_s2 + $0x80] sm:$0xff] }
 0x1f1   :  { %v173_v22 = vmul.f32 %v171_v20, %v1549_v45  ;;  %v174_v23 = vmul.f32 %v172_v21, %v1552_v46 }
 0x1f3   :  { %179 = vst.msk [vmem:[#allocation2 + $0x10] sm:$0xff] %vm124_vm1, %v174_v23 }
 0x1fa   :  { %v214_v24 = vld [vmem:[#allocation2 + $0x10] sm:$0xff] }
 0x1fb   :  { %v1424_v25 = vpack.i.bf16 %v214_v24, %v173_v22 }
 0x1fd   :  { %1425 = vrot.lane.b32.xlu1 %v1424_v25, %s1492_s26  ;;  %1415 = vrot.lane.b32.xlu0 %v1424_v25, %s1493_s27 }
 0x1fe   :  { %1395 = vrot.lane.b32.xlu2 %v1424_v25, %s1494_s28 }
 0x205   :  { %191 = vperm.xlu0 %1435, %v1578_v26   ;;  %186 = vperm.xlu1 %1434, %v1590_v33  }
 0x206   :  { %218 = vrot.lane.b32.xlu2 %v1486_v44, %s1494_s28 }
 0x20d   :  { %201 = vperm.xlu1 %1434, %v1603_v37  }
 0x20e   :  { %1400 = vrot.lane.b32.xlu2 %v1424_v25, %s1489_s1 }
 0x216   :  { %1405 = vrot.lane.b32.xlu2 %v1424_v25, %s1490_s25 }
 0x21e   :  { %1410 = vrot.lane.b32.xlu2 %v1424_v25, %s1488_s0 }
 0x226   :  { %1420 = vrot.lane.b32.xlu2 %v1424_v25, %s1495_s29  ;;  %s1251_s29 = sshll.u32 %s1909_s4, 4  ;;  %s1252_s29 = int_to_ptr.hbm [resolvable:$true] %s1251_s29 }
 0x22e   :  { %1430 = vrot.lane.b32.xlu2 %v1424_v25, %s1496_s30  ;;  %v1299_v25 = vld [vmem:[%s1907_s2 + $0x70] sm:$0xff]  ;;  %s1501_s30 = smov 256  }
 0x236   :  { %196 = vperm.xlu2 %1436, %v1624_v57  }
 0x258   :  { %v1396_v27 = vpop.permute.xlu2 %1395 }
 0x259   :  { %v1398_v28 = vunpack.i.h.bf16 %v1396_v27  ;;  %v1397_v29 = vunpack.i.l.bf16 %v1396_v27  ;;  %v1300_v27 = vld [vmem:[%s1907_s2 + $0x78] sm:$0xff] }
 0x25b   :  { %v226_v32 = vsel %vm224_vm6, %v1397_v29, %v1398_v28  ;;  %v1312_v28 = vld [vmem:[%s1907_s2 + $0x98] sm:$0xff] }
 0x25c   :  { %286 = vmatpush.msrb.mxu1 %v226_v32  ;;  %1370 = vmatpush.msra.mxu3 %v226_v32  ;;  %v1334_v32 = vld [vmem:[%s1907_s2 + $0xc8] sm:$0xff] }
 0x25d   :  { %1270 = vmatmul.msk.f32.vlgmr.msra.gmra.mxu3 %vm229_vm7, %v209_v30  ;;  %1269 = vmatmul.msk.f32.vlgmr.msrb.gmra.mxu1 %vm229_vm7, %v208_v31 }
 0x260   :  { %v219_v34 = vpop.permute.xlu2 %218 }
 0x261   :  { %v225_v35 = vsel %vm224_vm6, %v219_v34, %v1397_v29  ;;  %v1321_v29 = vld [vmem:[%s1907_s2 + $0xa0] sm:$0xff]  ;;  %v1323_v34 = vld [vmem:[%s1907_s2 + $0xb0] sm:$0xff] }
 0x262   :  { %257 = vmatpush.msrb.mxu0 %v225_v35  ;;  %1369 = vmatpush.msra.mxu2 %v225_v35  ;;  %v1335_v35 = vld [vmem:[%s1907_s2 + $0xd0] sm:$0xff] }
 0x263   :  { %1266 = vmatmul.msk.f32.vlgmr.msra.gmra.mxu2 %vm229_vm7, %v209_v30  ;;  %1265 = vmatmul.msk.f32.vlgmr.msrb.gmra.mxu0 %vm229_vm7, %v208_v31  ;;  %v1333_v30 = vld [vmem:[%s1907_s2 + $0xc0] sm:$0xff]  ;;  %v1322_v31 = vld [vmem:[%s1907_s2 + $0xa8] sm:$0xff] }
 0x265   :  { %1271 = vmatmul.msk.f32.gmra.mxu3 %vm229_vm7, %v210_v36 }
 0x268   :  { %v1401_v39 = vpop.permute.xlu2 %1400 }
 0x269   :  { %v1403_v40 = vunpack.i.h.bf16 %v1401_v39  ;;  %v1402_v41 = vunpack.i.l.bf16 %v1401_v39  ;;  %v1345_v39 = vld [vmem:[%s1907_s2 + $0xe0] sm:$0xff] }
 0x26b   :  { %1267 = vmatmul.msk.f32.gmra.mxu2 %vm229_vm7, %v210_v36  ;;  %v414_v43 = vsel %vm413_vm8, %v408_v38, %v1402_v41  ;;  %v415_v44 = vsel %vm413_vm8, %v1402_v41, %v1403_v40  ;;  %v1324_v36 = vld [vmem:[%s1907_s2 + $0xb8] sm:$0xff]  ;;  %v1357_v40 = vld [vmem:[%s1907_s2 + $0x100] sm:$0xff]  ;;  %v1346_v41 = vld [vmem:[%s1907_s2 + $0xe8] sm:$0xff] }
 0x26c   :  { %445 = vmatpush.msrb.mxu2 %v414_v43  ;;  %474 = vmatpush.msrb.mxu3 %v415_v44  ;;  %v1336_v38 = vld [vmem:[%s1907_s2 + $0xd8] sm:$0xff]  ;;  %v1347_v44 = vld [vmem:[%s1907_s2 + $0xf0] sm:$0xff] }
 0x26d   :  { %1272 = vmatmul.msk.f32.gmra.mxu3 %vm229_vm7, %v211_v42 }
 0x26e   :  { %622 = vmatpush.msra.mxu2 %v173_v22  ;;  %651 = vmatpush.msra.mxu3 %v214_v24  ;;  %v1298_v22 = vld [vmem:[%s1907_s2 + $0x68] sm:$0xff] }
 0x26f   :  { %v1416_v51 = vpop.permute.xlu0 %1415  ;;  %v1426_v17 = vpop.permute.xlu1 %1425  ;;  %v1310_v24 = vld [vmem:[%s1907_s2 + $0x88] sm:$0xff] }
 0x270   :  { %v1406_v48 = vpop.permute.xlu2 %1405  ;;  %v1418_v56 = vunpack.i.h.bf16 %v1416_v51  ;;  %v1417_v58 = vunpack.i.l.bf16 %v1416_v51  ;;  %v1428_v19 = vunpack.i.h.bf16 %v1426_v17  ;;  %v1427_v21 = vunpack.i.l.bf16 %v1426_v17 }
 0x271   :  { %v1408_v49 = vunpack.i.h.bf16 %v1406_v48  ;;  %v1407_v50 = vunpack.i.l.bf16 %v1406_v48 }
 0x272   :  { %v774_v0 = vsel %vm773_vm10, %v1417_v58, %v1418_v56  ;;  %v956_v23 = vsel %vm955_vm14, %v1427_v21, %v1428_v19 }
 0x273   :  { %1268 = vmatmul.msk.f32.gmra.mxu2 %vm229_vm7, %v211_v42  ;;  %v320_v53 = vsel %vm319_vm9, %v314_v47, %v1407_v50  ;;  %v321_v54 = vsel %vm319_vm9, %v1407_v50, %v1408_v49  ;;  %v1358_v42 = vld [vmem:[%s1907_s2 + $0x108] sm:$0xff]  ;;  %v1359_v47 = vld [vmem:[%s1907_s2 + $0x110] sm:$0xff] }
 0x274   :  { %351 = vmatpush.msra.mxu0 %v320_v53  ;;  %380 = vmatpush.msra.mxu1 %v321_v54  ;;  %v1360_v53 = vld [vmem:[%s1907_s2 + $0x118] sm:$0xff] }
 0x275   :  { %1277 = vmatmul.msk.f32.vlgmr.msra.gmra.mxu0 %vm229_vm7, %v1273_v52  ;;  %1281 = vmatmul.msk.f32.vlgmr.msra.gmra.mxu1 %vm229_vm7, %v1273_v52  ;;  %v1348_v52 = vld [vmem:[%s1907_s2 + $0xf8] sm:$0xff]  ;;  %s1500_s2 = smov [#allocation3]  }
 0x276   :  { %1293 = vmatmul.msk.f32.vlgmr.msrb.gmra.mxu3 %vm229_vm7, %v1285_v55 }
 0x277   :  { %833 = vmatpush.msrb.mxu3 %v1418_v56 }
 0x278   :  { %v1411_v59 = vpop.permute.xlu2 %1410 }
 0x279   :  { %v1413_v60 = vunpack.i.h.bf16 %v1411_v59  ;;  %v1412_v61 = vunpack.i.l.bf16 %v1411_v59 }
 0x27b   :  { %1289 = vmatmul.msk.f32.vlgmr.msrb.gmra.mxu2 %vm229_vm7, %v1285_v55  ;;  %v508_v1 = vsel %vm507_vm11, %v502_v62, %v1412_v61  ;;  %v509_v2 = vsel %vm507_vm11, %v1412_v61, %v1413_v60  ;;  %v187_v55 = vpop.permute.xlu1 %186 }
 0x27c   :  { %804 = vmatpush.msrb.mxu2 %v774_v0  ;;  %539 = vmatpush.msrb.mxu0 %v508_v1  ;;  %v192_v0 = vpop.permute.xlu0 %191 }
 0x27d   :  { %568 = vmatpush.msrb.mxu1 %v509_v2  ;;  %1278 = vmatmul.msk.f32.gmra.mxu0 %vm229_vm7, %v1274_v63 }
 0x27e   :  { %1282 = vmatmul.msk.f32.gmra.mxu1 %vm229_vm7, %v1274_v63  ;;  %1294 = vmatmul.msk.f32.gmra.mxu3 %vm229_vm7, %v1286_v3 }
 0x280   :  { %v1421_v5 = vpop.permute.xlu2 %1420 }
 0x281   :  { %v1423_v6 = vunpack.i.h.bf16 %v1421_v5  ;;  %v1422_v7 = vunpack.i.l.bf16 %v1421_v5 }
 0x283   :  { %1290 = vmatmul.msk.f32.gmra.mxu2 %vm229_vm7, %v1286_v3  ;;  %742 = vmatpush.msra.mxu1 %v1423_v6  ;;  %v683_v9 = vsel %vm682_vm12, %v1422_v7, %v1423_v6 }
 0x284   :  { %713 = vmatpush.msra.mxu0 %v683_v9 }
 0x285   :  { %1279 = vmatmul.msk.f32.gmra.mxu0 %vm229_vm7, %v1275_v8 }
 0x286   :  { %1283 = vmatmul.msk.f32.gmra.mxu1 %vm229_vm7, %v1275_v8  ;;  %1295 = vmatmul.msk.f32.gmra.mxu3 %vm229_vm7, %v1287_v10 }
 0x288   :  { %v1431_v13 = vpop.permute.xlu2 %1430 }
 0x289   :  { %v1433_v14 = vunpack.i.h.bf16 %v1431_v13  ;;  %v1432_v15 = vunpack.i.l.bf16 %v1431_v13 }
 0x28b   :  { %1291 = vmatmul.msk.f32.gmra.mxu2 %vm229_vm7, %v1287_v10  ;;  %v865_v20 = vsel %vm864_vm13, %v1432_v15, %v1433_v14 }
 0x28d   :  { %1280 = vmatmul.msk.f32.gmra.mxu0 %vm229_vm7, %v1276_v11 }
 0x28e   :  { %1284 = vmatmul.msk.f32.gmra.mxu1 %vm229_vm7, %v1276_v11  ;;  %1296 = vmatmul.msk.f32.gmra.mxu3 %vm229_vm7, %v1288_v12 }
 0x290   :  { %v197_v11 = vpop.permute.xlu2 %196 }
 0x293   :  { %1292 = vmatmul.msk.f32.gmra.mxu2 %vm229_vm7, %v1288_v12 }
 0x295   :  { %1301 = vmatmul.msk.f32.vlgmr.msrb.gmra.mxu0 %vm229_vm7, %v1297_v16 }
 0x296   :  { %1305 = vmatmul.msk.f32.vlgmr.msrb.gmra.mxu1 %vm229_vm7, %v1297_v16  ;;  %1317 = vmatmul.msk.f32.vlgmr.msra.gmra.mxu3 %vm229_vm7, %v1309_v18 }
 0x297   :  { %895 = vmatpush.msrb.mxu0 %v865_v20  ;;  %924 = vmatpush.msrb.mxu1 %v1433_v14 }
 0x298   :  { %1015 = vmatpush.msra.mxu3 %v1428_v19 }
 0x29b   :  { %1313 = vmatmul.msk.f32.vlgmr.msra.gmra.mxu2 %vm229_vm7, %v1309_v18 }
 0x29c   :  { %986 = vmatpush.msra.mxu2 %v956_v23 }
 0x29d   :  { %1302 = vmatmul.msk.f32.gmra.mxu0 %vm229_vm7, %v1298_v22 }
 0x29e   :  { %1306 = vmatmul.msk.f32.gmra.mxu1 %vm229_vm7, %v1298_v22  ;;  %1318 = vmatmul.msk.f32.gmra.mxu3 %vm229_vm7, %v1310_v24  ;;  %v202_v22 = vpop.permute.xlu1 %201 }
 0x2a3   :  { %1314 = vmatmul.msk.f32.gmra.mxu2 %vm229_vm7, %v1310_v24 }
 0x2a5   :  { %1303 = vmatmul.msk.f32.gmra.mxu0 %vm229_vm7, %v1299_v25 }
 0x2a6   :  { %1307 = vmatmul.msk.f32.gmra.mxu1 %vm229_vm7, %v1299_v25  ;;  %1319 = vmatmul.msk.f32.gmra.mxu3 %vm229_vm7, %v1311_v4 }
 0x2ab   :  { %1315 = vmatmul.msk.f32.gmra.mxu2 %vm229_vm7, %v1311_v4 }
 0x2ad   :  { %1304 = vmatmul.msk.f32.gmra.mxu0 %vm229_vm7, %v1300_v27 }
 0x2ae   :  { %1308 = vmatmul.msk.f32.gmra.mxu1 %vm229_vm7, %v1300_v27  ;;  %1320 = vmatmul.msk.f32.gmra.mxu3 %vm229_vm7, %v1312_v28 }
 0x2b3   :  { %1316 = vmatmul.msk.f32.gmra.mxu2 %vm229_vm7, %v1312_v28 }
 0x2b5   :  { %1325 = vmatmul.msk.f32.vlgmr.msra.gmra.mxu0 %vm229_vm7, %v1321_v29 }
 0x2b6   :  { %1329 = vmatmul.msk.f32.vlgmr.msra.gmra.mxu1 %vm229_vm7, %v1321_v29  ;;  %1341 = vmatmul.msk.f32.vlgmr.msrb.gmra.mxu3 %vm229_vm7, %v1333_v30 }
 0x2bb   :  { %1337 = vmatmul.msk.f32.vlgmr.msrb.gmra.mxu2 %vm229_vm7, %v1333_v30 }
 0x2bd   :  { %1326 = vmatmul.msk.f32.gmra.mxu0 %vm229_vm7, %v1322_v31 }
 0x2be   :  { %1330 = vmatmul.msk.f32.gmra.mxu1 %vm229_vm7, %v1322_v31  ;;  %1342 = vmatmul.msk.f32.gmra.mxu3 %vm229_vm7, %v1334_v32 }
 0x2c3   :  { %1338 = vmatmul.msk.f32.gmra.mxu2 %vm229_vm7, %v1334_v32 }
 0x2c5   :  { %1327 = vmatmul.msk.f32.gmra.mxu0 %vm229_vm7, %v1323_v34 }
 0x2c6   :  { %1331 = vmatmul.msk.f32.gmra.mxu1 %vm229_vm7, %v1323_v34  ;;  %1343 = vmatmul.msk.f32.gmra.mxu3 %vm229_vm7, %v1335_v35 }
 0x2cb   :  { %1339 = vmatmul.msk.f32.gmra.mxu2 %vm229_vm7, %v1335_v35 }
 0x2cd   :  { %1328 = vmatmul.msk.f32.gmra.mxu0 %vm229_vm7, %v1324_v36 }
 0x2ce   :  { %1332 = vmatmul.msk.f32.gmra.mxu1 %vm229_vm7, %v1324_v36  ;;  %1344 = vmatmul.msk.f32.gmra.mxu3 %vm229_vm7, %v1336_v38 }
 0x2d3   :  { %1340 = vmatmul.msk.f32.gmra.mxu2 %vm229_vm7, %v1336_v38 }
 0x2d5   :  { %1349 = vmatmul.msk.f32.vlgmr.msrb.gmra.mxu0 %vm229_vm7, %v1345_v39 }
 0x2d6   :  { %1353 = vmatmul.msk.f32.vlgmr.msrb.gmra.mxu1 %vm229_vm7, %v1345_v39  ;;  %1365 = vmatmul.msk.f32.vlgmr.msra.gmra.mxu3 %vm229_vm7, %v1357_v40 }
 0x2da   :  { %v288_v49 = vpop.f32.mrf.mxu1 }
 0x2db   :  { %1361 = vmatmul.msk.f32.vlgmr.msra.gmra.mxu2 %vm229_vm7, %v1357_v40  ;;  %v301_v58 = vadd.f32 %v288_v49, %v187_v55 }
 0x2dd   :  { %1350 = vmatmul.msk.f32.gmra.mxu0 %vm229_vm7, %v1346_v41 }
 0x2de   :  { %1354 = vmatmul.msk.f32.gmra.mxu1 %vm229_vm7, %v1346_v41  ;;  %1366 = vmatmul.msk.f32.gmra.mxu3 %vm229_vm7, %v1358_v42 }
 0x2e0   :  { %v291_v43 = vpop.f32.mrf.mxu3  ;;  %v259_v51 = vpop.f32.mrf.mxu0 }
 0x2e1   :  { %v300_v56 = vadd.f32 %v259_v51, %v187_v55  ;;  %v303_v5 = vadd.f32 %v291_v43, %v192_v0 }
 0x2e3   :  { %1362 = vmatmul.msk.f32.gmra.mxu2 %vm229_vm7, %v1358_v42 }
 0x2e5   :  { %1351 = vmatmul.msk.f32.gmra.mxu0 %vm229_vm7, %v1347_v44 }
 0x2e6   :  { %1355 = vmatmul.msk.f32.gmra.mxu1 %vm229_vm7, %v1347_v44  ;;  %1367 = vmatmul.msk.f32.gmra.mxu3 %vm229_vm7, %v1359_v47  ;;  %v262_v48 = vpop.f32.mrf.mxu2 }
 0x2e7   :  { %v302_v2 = vadd.f32 %v262_v48, %v192_v0 }
 0x2e8   :  { %v294_v50 = vpop.f32.mrf.mxu3 }
 0x2e9   :  { %v305_v16 = vadd.f32 %v294_v50, %v197_v11 }
 0x2eb   :  { %1363 = vmatmul.msk.f32.gmra.mxu2 %vm229_vm7, %v1359_v47 }
 0x2ed   :  { %1352 = vmatmul.msk.f32.gmra.mxu0 %vm229_vm7, %v1348_v52 }
 0x2ee   :  { %1356 = vmatmul.msk.f32.gmra.mxu1 %vm229_vm7, %v1348_v52  ;;  %1368 = vmatmul.msk.f32.gmra.mxu3 %vm229_vm7, %v1360_v53  ;;  %v265_v54 = vpop.f32.mrf.mxu2 }
 0x2ef   :  { %v304_v14 = vadd.f32 %v265_v54, %v197_v11 }
 0x2f0   :  { %v297_v59 = vpop.f32.mrf.mxu3 }
 0x2f1   :  { %v307_v27 = vadd.f32 %v297_v59, %v202_v22 }
 0x2f2   :  { %v353_v60 = vpop.f32.mrf.mxu0  ;;  %v382_v61 = vpop.f32.mrf.mxu1 }
 0x2f3   :  { %1364 = vmatmul.msk.f32.gmra.mxu2 %vm229_vm7, %v1360_v53  ;;  %v395_v62 = vadd.f32 %v382_v61, %v301_v58  ;;  %v394_v63 = vadd.f32 %v353_v60, %v300_v56 }
 0x2f6   :  { %v268_v1 = vpop.f32.mrf.mxu2 }
 0x2f7   :  { %v306_v25 = vadd.f32 %v268_v1, %v202_v22 }
 0x2f9   :  { %v476_v3 = vpop.f32.mrf.mxu3 }
 0x2fa   :  { %v1779_v6 = vadd.f32 %v476_v3, %v395_v62  ;;  %v356_v7 = vpop.f32.mrf.mxu0 }
 0x2fb   :  { %v396_v8 = vadd.f32 %v356_v7, %v302_v2  ;;  %v385_v9 = vpop.f32.mrf.mxu1 }
 0x2fc   :  { %v397_v10 = vadd.f32 %v385_v9, %v303_v5 }
 0x2fe   :  { %v447_v12 = vpop.f32.mrf.mxu2 }
 0x2ff   :  { %v488_v13 = vadd.f32 %v447_v12, %v394_v63 }
 0x301   :  { %v479_v15 = vpop.f32.mrf.mxu3 }
 0x302   :  { %v1781_v17 = vadd.f32 %v479_v15, %v397_v10  ;;  %v359_v18 = vpop.f32.mrf.mxu0 }
 0x303   :  { %v398_v19 = vadd.f32 %v359_v18, %v304_v14  ;;  %v388_v20 = vpop.f32.mrf.mxu1 }
 0x304   :  { %v399_v21 = vadd.f32 %v388_v20, %v305_v16 }
 0x306   :  { %v450_v23 = vpop.f32.mrf.mxu2 }
 0x307   :  { %v1783_v24 = vadd.f32 %v450_v23, %v396_v8 }
 0x309   :  { %v482_v4 = vpop.f32.mrf.mxu3 }
 0x30a   :  { %v1785_v28 = vadd.f32 %v482_v4, %v399_v21  ;;  %v362_v29 = vpop.f32.mrf.mxu0 }
 0x30b   :  { %v400_v30 = vadd.f32 %v362_v29, %v306_v25  ;;  %v391_v31 = vpop.f32.mrf.mxu1 }
 0x30c   :  { %v401_v32 = vadd.f32 %v391_v31, %v307_v27 }
 0x30e   :  { %v453_v34 = vpop.f32.mrf.mxu2 }
 0x30f   :  { %v1787_v35 = vadd.f32 %v453_v34, %v398_v19 }
 0x311   :  { %v485_v36 = vpop.f32.mrf.mxu3 }
 0x312   :  { %v1789_v38 = vadd.f32 %v485_v36, %v401_v32  ;;  %v541_v39 = vpop.f32.mrf.mxu0 }
 0x313   :  { %v570_v40 = vpop.f32.mrf.mxu1  ;;  %v582_v20 = vadd.f32 %v541_v39, %v488_v13 }
 0x314   :  { %v583_v12 = vadd.f32 %v570_v40, %v1779_v6 }
 0x316   :  { %v456_v41 = vpop.f32.mrf.mxu2 }
 0x317   :  { %v1791_v42 = vadd.f32 %v456_v41, %v400_v30 }
 0x319   :  { %v653_v43 = vpop.f32.mrf.mxu3 }
 0x31a   :  { %v544_v44 = vpop.f32.mrf.mxu0  ;;  %v666_v15 = vadd.f32 %v653_v43, %v583_v12 }
 0x31b   :  { %v573_v47 = vpop.f32.mrf.mxu1  ;;  %v584_v36 = vadd.f32 %v544_v44, %v1783_v24 }
 0x31c   :  { %v585_v29 = vadd.f32 %v573_v47, %v1781_v17 }
 0x31e   :  { %v624_v48 = vpop.f32.mrf.mxu2 }
 0x31f   :  { %v665_v23 = vadd.f32 %v624_v48, %v582_v20 }
 0x321   :  { %v656_v49 = vpop.f32.mrf.mxu3 }
 0x322   :  { %v1793_v50 = vpop.f32.mrf.mxu0  ;;  %v668_v32 = vadd.f32 %v656_v49, %v585_v29 }
 0x323   :  { %v576_v51 = vpop.f32.mrf.mxu1 }
 0x326   :  { %v627_v52 = vpop.f32.mrf.mxu2 }
 0x327   :  { %v667_v43 = vadd.f32 %v627_v52, %v584_v36 }
 0x329   :  { %v659_v53 = vpop.f32.mrf.mxu3 }
 0x32a   :  { %v1795_v54 = vpop.f32.mrf.mxu0 }
 0x32b   :  { %v1797_v55 = vpop.f32.mrf.mxu1 }
 0x32e   :  { %v1799_v56 = vpop.f32.mrf.mxu2 }
 0x331   :  { %v1801_v58 = vpop.f32.mrf.mxu3 }
 0x332   :  { %v715_v59 = vpop.f32.mrf.mxu0 }
 0x333   :  { %v744_v60 = vpop.f32.mrf.mxu1  ;;  %v756_v4 = vadd.f32 %v715_v59, %v665_v23  ;;  %v587_v59 = vadd.f32 %v576_v51, %v1785_v28  ;;  %v586_v51 = vadd.f32 %v1793_v50, %v1787_v35 }
 0x334   :  { %v757_v18 = vadd.f32 %v744_v60, %v666_v15 }
 0x335   :  { %v669_v20 = vadd.f32 %v1799_v56, %v586_v51 }
 0x336   :  { %v1803_v61 = vpop.f32.mrf.mxu2 }
 0x339   :  { %v835_v62 = vpop.f32.mrf.mxu3 }
 0x33a   :  { %v718_v63 = vpop.f32.mrf.mxu0  ;;  %v848_v21 = vadd.f32 %v835_v62, %v757_v18 }
 0x33b   :  { %v747_v0 = vpop.f32.mrf.mxu1  ;;  %v758_v60 = vadd.f32 %v718_v63, %v667_v43 }
 0x33c   :  { %v759_v39 = vadd.f32 %v747_v0, %v668_v32 }
 0x33e   :  { %v806_v1 = vpop.f32.mrf.mxu2 }
 0x33f   :  { %v847_v31 = vadd.f32 %v806_v1, %v756_v4  ;;  %v670_v1 = vadd.f32 %v659_v53, %v587_v59 }
 0x341   :  { %v838_v2 = vpop.f32.mrf.mxu3 }
 0x342   :  { %v721_v3 = vpop.f32.mrf.mxu0  ;;  %v850_v17 = vadd.f32 %v838_v2, %v759_v39 }
 0x343   :  { %v750_v5 = vpop.f32.mrf.mxu1  ;;  %v760_v4 = vadd.f32 %v721_v3, %v669_v20 }
 0x346   :  { %v809_v7 = vpop.f32.mrf.mxu2 }
 0x347   :  { %v849_v44 = vadd.f32 %v809_v7, %v758_v60 }
 0x349   :  { %v841_v8 = vpop.f32.mrf.mxu3 }
 0x34a   :  { %v1805_v9 = vpop.f32.mrf.mxu0 }
 0x34b   :  { %v1807_v10 = vpop.f32.mrf.mxu1 }
 0x34e   :  { %v812_v11 = vpop.f32.mrf.mxu2 }
 0x34f   :  { %v851_v56 = vadd.f32 %v812_v11, %v760_v4 }
 0x351   :  { %v1810_v14 = vpop.f32.mrf.mxu3 }
 0x352   :  { %v897_v19 = vpop.f32.mrf.mxu0 }
 0x353   :  { %v926_v16 = vpop.f32.mrf.mxu1  ;;  %v938_v13 = vadd.f32 %v897_v19, %v847_v31 }
 0x354   :  { %v939_v25 = vadd.f32 %v926_v16, %v848_v21  ;;  %v761_v16 = vadd.f32 %v750_v5, %v670_v1  ;;  %v589_v5 = vadd.f32 %v1797_v55, %v1789_v38  ;;  %v588_v38 = vadd.f32 %v1795_v54, %v1791_v42 }
 0x356   :  { %v1812_v22 = vpop.f32.mrf.mxu2  ;;  %v852_v53 = vadd.f32 %v841_v8, %v761_v16  ;;  %v672_v8 = vadd.f32 %v1801_v58, %v589_v5  ;;  %v671_v58 = vadd.f32 %v1803_v61, %v588_v38  ;;  %v1498_v38 = vmov 1  }
 0x357   :  { %1437 = vset.pattern.permute.xlu2 %v1498_v38  ;;  %1438 = vset.pattern.permute.xlu0 %v1498_v38 }
 0x358   :  { %v763_v29 = vadd.f32 %v1807_v10, %v672_v8  ;;  %v762_v11 = vadd.f32 %v1805_v9, %v671_v58  ;;  %1439 = vset.pattern.permute.xlu1 %v1498_v38 }
 0x359   :  { %v1017_v27 = vpop.f32.mrf.mxu3 }
 0x35a   :  { %v1815_v30 = vadd.f32 %v1017_v27, %v939_v25  ;;  %v900_v40 = vpop.f32.mrf.mxu0  ;;  %v854_v3 = vadd.f32 %v1810_v14, %v763_v29 }
 0x35b   :  { %v929_v6 = vpop.f32.mrf.mxu1  ;;  %v940_v63 = vadd.f32 %v900_v40, %v849_v44 }
 0x35c   :  { %v1038_v34 = vmul.f32 %v1815_v30, %v1552_v46  ;;  %v941_v12 = vadd.f32 %v929_v6, %v850_v17 }
 0x35e   :  { %v988_v41 = vpop.f32.mrf.mxu2  ;;  %v1062_v47 = vmul.f32 %v1038_v34, %v1815_v30  ;;  %v1045_v24 = vsel %vm124_vm1, %v1038_v34, 0.0 }
 0x35f   :  { %v1820_v48 = vadd.f32 %v988_v41, %v938_v13  ;;  %v853_v41 = vadd.f32 %v1812_v22, %v762_v11 }
 0x360   :  { %v1069_v28 = vsel %vm124_vm1, %v1062_v47, 0.0 }
 0x361   :  { %v1020_v62 = vpop.f32.mrf.mxu3  ;;  %v1037_v49 = vmul.f32 %v1820_v48, %v1549_v45 }
 0x362   :  { %v1828_v18 = vadd.f32 %v1020_v62, %v941_v12  ;;  %v903_v21 = vpop.f32.mrf.mxu0 }
 0x363   :  { %v932_v0 = vpop.f32.mrf.mxu1  ;;  %v1046_v15 = vadd.f32 %v1045_v24, %v1037_v49  ;;  %v1061_v52 = vmul.f32 %v1037_v49, %v1820_v48  ;;  %v942_v55 = vadd.f32 %v903_v21, %v851_v56 }
 0x364   :  { %v943_v23 = vadd.f32 %v932_v0, %v852_v53  ;;  %v1040_v25 = vmul.f32 %v1828_v18, %v1552_v46 }
 0x365   :  { %1047 = vadd.xlane.f32.xlu2 %v1046_v15  ;;  %v1070_v2 = vadd.f32 %v1069_v28, %v1061_v52 }
 0x366   :  { %v991_v19 = vpop.f32.mrf.mxu2  ;;  %v1049_v31 = vsel %vm124_vm1, %v1040_v25, 0.0  ;;  %v1064_v9 = vmul.f32 %v1040_v25, %v1828_v18 }
 0x367   :  { %v1834_v7 = vadd.f32 %v991_v19, %v940_v63  ;;  %1071 = vadd.xlane.f32.xlu1 %v1070_v2 }
 0x368   :  { %v1073_v22 = vsel %vm124_vm1, %v1064_v9, 0.0 }
 0x369   :  { %v1023_v35 = vpop.f32.mrf.mxu3  ;;  %v1039_v50 = vmul.f32 %v1834_v7, %v1549_v45 }
 0x36a   :  { %v1843_v27 = vadd.f32 %v1023_v35, %v943_v23  ;;  %v906_v54 = vpop.f32.mrf.mxu0 }
 0x36b   :  { %v935_v6 = vpop.f32.mrf.mxu1  ;;  %v1050_v32 = vadd.f32 %v1049_v31, %v1039_v50  ;;  %v944_v59 = vadd.f32 %v906_v54, %v853_v41  ;;  %v1063_v60 = vmul.f32 %v1039_v50, %v1834_v7 }
 0x36c   :  { %v1042_v36 = vmul.f32 %v1843_v27, %v1552_v46  ;;  %v945_v10 = vadd.f32 %v935_v6, %v854_v3 }
 0x36d   :  { %v1074_v12 = vadd.f32 %v1073_v22, %v1063_v60 }
 0x36e   :  { %v994_v34 = vpop.f32.mrf.mxu2  ;;  %v1053_v14 = vsel %vm124_vm1, %v1042_v36, 0.0  ;;  %v1066_v15 = vmul.f32 %v1042_v36, %v1843_v27 }
 0x36f   :  { %v1853_v13 = vadd.f32 %v994_v34, %v942_v55  ;;  %1051 = vadd.xlane.f32.xlu1 %v1050_v32 }
 0x371   :  { %v1026_v39 = vpop.f32.mrf.mxu3  ;;  %v1041_v42 = vmul.f32 %v1853_v13, %v1549_v45 }
 0x372   :  { %v1858_v40 = vadd.f32 %v1026_v39, %v945_v10 }
 0x373   :  { %v1054_v43 = vadd.f32 %v1053_v14, %v1041_v42  ;;  %v1065_v52 = vmul.f32 %v1041_v42, %v1853_v13 }
 0x374   :  { %v1044_v61 = vmul.f32 %v1858_v40, %v1552_v46 }
 0x375   :  { %1055 = vadd.xlane.f32.xlu0 %v1054_v43 }
 0x376   :  { %v997_v17 = vpop.f32.mrf.mxu2  ;;  %v1068_v62 = vmul.f32 %v1044_v61, %v1858_v40  ;;  %v1057_v1 = vsel %vm124_vm1, %v1044_v61, 0.0 }
 0x377   :  { %v1865_v47 = vadd.f32 %v997_v17, %v944_v59 }
 0x378   :  { %v1081_v44 = vsel %vm124_vm1, %v1068_v62, 0.0 }
 0x379   :  { %v1043_v49 = vmul.f32 %v1865_v47, %v1549_v45  ;;  %v1077_v45 = vsel %vm124_vm1, %v1066_v15, 0.0 }
 0x37a   :  { %v1078_v16 = vadd.f32 %v1077_v45, %v1065_v52 }
 0x37b   :  { %v1058_v46 = vadd.f32 %v1057_v1, %v1043_v49  ;;  %v1067_v24 = vmul.f32 %v1043_v49, %v1865_v47 }
 0x37d   :  { %1075 = vadd.xlane.f32.xlu0 %v1074_v12  ;;  %1059 = vadd.xlane.f32.xlu2 %v1058_v46  ;;  %v1082_v0 = vadd.f32 %v1081_v44, %v1067_v24 }
 0x37f   :  { %1083 = vadd.xlane.f32.xlu1 %v1082_v0 }
 0x385   :  { %1079 = vadd.xlane.f32.xlu2 %v1078_v16 }
 0x3d8   :  { %v1048_v28 = vpop.xlane.xlu2 %1047 }
 0x3d9   :  { %v1085_v51 = vmul.f32 0.0078125, %v1048_v28 }
 0x3da   :  { %v1072_v63 = vpop.xlane.xlu1 %1071 }
 0x3db   :  { %v1093_v2 = vmul.f32 %v1085_v51, %v1085_v51  ;;  %v1089_v53 = vmul.f32 0.0078125, %v1072_v63 }
 0x3dd   :  { %v1097_v19 = vsub.f32 %v1089_v53, %v1093_v2 }
 0x3df   :  { %v1101_v20 = vadd.f32 1e-05, %v1097_v19 }
 0x3e1   :  { %1449 = vrsqrt.f32 %v1101_v20  ;;  %vm1111_vm0 = vweird.f32 %v1101_v20 }
 0x3e2   :  { %v1052_v4 = vpop.xlane.xlu1 %1051 }
 0x3e3   :  { %v1086_v50 = vmul.f32 0.0078125, %v1052_v4 }
 0x3e5   :  { %v1094_v55 = vmul.f32 %v1086_v50, %v1086_v50 }
 0x3e7   :  { %v1450_v5 = vpop.eup %1449 }
 0x3e8   :  { %v1106_v21 = vmul.f32 %v1450_v5, %v1101_v20  ;;  %v1056_v23 = vpop.xlane.xlu0 %1055  ;;  %vm1112_vm15 = vweird.f32 %v1450_v5 }
 0x3e9   :  { %vm1113_vm2 = vmor %vm1111_vm0, %vm1112_vm15  ;;  %v1087_v39 = vmul.f32 0.0078125, %v1056_v23 }
 0x3ea   :  { %v1107_v25 = vmul.f32 %v1450_v5, %v1106_v21 }
 0x3eb   :  { %v1095_v61 = vmul.f32 %v1087_v39, %v1087_v39 }
 0x3ec   :  { %v1108_v35 = vmul.f32 0.5, %v1107_v25 }
 0x3ee   :  { %v1109_v8 = vsub.f32 1.5, %v1108_v35 }
 0x3f0   :  { %v1076_v56 = vpop.xlane.xlu0 %1075  ;;  %v1060_v29 = vpop.xlane.xlu2 %1059  ;;  %v1110_v31 = vmul.f32 %v1450_v5, %v1109_v8 }
 0x3f1   :  { %v1090_v6 = vmul.f32 0.0078125, %v1076_v56  ;;  %v1088_v32 = vmul.f32 0.0078125, %v1060_v29 }
 0x3f2   :  { %v1084_v3 = vpop.xlane.xlu1 %1083  ;;  %v1114_v34 = vsel %vm1113_vm2, %v1450_v5, %v1110_v31 }
 0x3f3   :  { %v1098_v36 = vsub.f32 %v1090_v6, %v1094_v55  ;;  %v1096_v58 = vmul.f32 %v1088_v32, %v1088_v32  ;;  %v1092_v10 = vmul.f32 0.0078125, %v1084_v3  ;;  %v1145_v11 = vmul.f32 %v1114_v34, %v1590_v33 }
 0x3f5   :  { %v1102_v42 = vadd.f32 1e-05, %v1098_v36  ;;  %v1100_v54 = vsub.f32 %v1092_v10, %v1096_v58  ;;  %v1149_v14 = vmul.f32 %v1145_v11, %v1085_v51 }
 0x3f7   :  { %1451 = vrsqrt.f32 %v1102_v42  ;;  %v1104_v41 = vadd.f32 1e-05, %v1100_v54  ;;  %1157 = vrot.lane.b32.xlu0 %v1149_v14, %s1488_s0  ;;  %vm1121_vm4 = vweird.f32 %v1102_v42 }
 0x3f8   :  { %v1080_v43 = vpop.xlane.xlu2 %1079 }
 0x3f9   :  { %1453 = vrsqrt.f32 %v1104_v41  ;;  %v1091_v59 = vmul.f32 0.0078125, %v1080_v43  ;;  %vm1141_vm7 = vweird.f32 %v1104_v41 }
 0x3fb   :  { %v1099_v17 = vsub.f32 %v1091_v59, %v1095_v61 }
 0x3fd   :  { %v1452_v9 = vpop.eup %1451  ;;  %v1103_v60 = vadd.f32 1e-05, %v1099_v17 }
 0x3fe   :  { %v1116_v62 = vmul.f32 %v1452_v9, %v1102_v42  ;;  %vm1122_vm3 = vweird.f32 %v1452_v9 }
 0x3ff   :  { %v1454_v49 = vpop.eup %1453  ;;  %1455 = vrsqrt.f32 %v1103_v60  ;;  %vm1123_vm6 = vmor %vm1121_vm4, %vm1122_vm3  ;;  %vm1131_vm10 = vweird.f32 %v1103_v60 }
 0x400   :  { %v1117_v22 = vmul.f32 %v1452_v9, %v1116_v62  ;;  %v1136_v1 = vmul.f32 %v1454_v49, %v1104_v41  ;;  %vm1142_vm5 = vweird.f32 %v1454_v49 }
 0x401   :  { %vm1143_vm8 = vmor %vm1141_vm7, %vm1142_vm5 }
 0x402   :  { %v1118_v12 = vmul.f32 0.5, %v1117_v22  ;;  %v1137_v46 = vmul.f32 %v1454_v49, %v1136_v1 }
 0x404   :  { %v1119_v24 = vsub.f32 1.5, %v1118_v12  ;;  %v1138_v44 = vmul.f32 0.5, %v1137_v46 }
 0x405   :  { %v1456_v0 = vpop.eup %1455 }
 0x406   :  { %v1139_v15 = vsub.f32 1.5, %v1138_v44  ;;  %v1126_v52 = vmul.f32 %v1456_v0, %v1103_v60  ;;  %v1120_v45 = vmul.f32 %v1452_v9, %v1119_v24  ;;  %vm1132_vm9 = vweird.f32 %v1456_v0 }
 0x407   :  { %vm1133_vm11 = vmor %vm1131_vm10, %vm1132_vm9 }
 0x408   :  { %v1127_v16 = vmul.f32 %v1456_v0, %v1126_v52  ;;  %v1124_v28 = vsel %vm1123_vm6, %v1452_v9, %v1120_v45  ;;  %v1140_v51 = vmul.f32 %v1454_v49, %v1139_v15 }
 0x409   :  { %v1146_v63 = vmul.f32 %v1124_v28, %v1578_v26 }
 0x40a   :  { %v1128_v2 = vmul.f32 0.5, %v1127_v16  ;;  %v1144_v53 = vsel %vm1143_vm8, %v1454_v49, %v1140_v51 }
 0x40b   :  { %v1150_v19 = vmul.f32 %v1146_v63, %v1086_v50  ;;  %v1148_v20 = vmul.f32 %v1144_v53, %v1603_v37  ;;  %v1499_v50 = vmov 2  }
 0x40c   :  { %v1129_v5 = vsub.f32 1.5, %v1128_v2 }
 0x40d   :  { %1159 = vrot.lane.b32.xlu2 %v1150_v19, %s1488_s0  ;;  %v1152_v21 = vmul.f32 %v1148_v20, %v1088_v32 }
 0x40e   :  { %v1130_v23 = vmul.f32 %v1456_v0, %v1129_v5 }
 0x40f   :  { %1163 = vrot.lane.b32.xlu0 %v1152_v21, %s1488_s0 }
 0x410   :  { %v1134_v25 = vsel %vm1133_vm11, %v1456_v0, %v1130_v23 }
 0x411   :  { %v1147_v4 = vmul.f32 %v1134_v25, %v1624_v57 }
 0x413   :  { %v1151_v35 = vmul.f32 %v1147_v4, %v1087_v39 }
 0x415   :  { %1175 = vperm.xlu2 %1437, %v1145_v11   ;;  %1161 = vrot.lane.b32.xlu1 %v1151_v35, %s1488_s0  ;;  %s1249_s0 = sshll.u32 %s1500_s2, 4  ;;  %s1250_s0 = int_to_ptr.vmem [resolvable:$true] %s1249_s0 }
 0x417   :  { %1180 = vperm.xlu0 %1438, %v1146_v63  }
 0x41d   :  { %1190 = vperm.xlu2 %1437, %v1148_v20   ;;  %1185 = vperm.xlu1 %1439, %v1147_v4  }
 0x41f   :  { %1442 = vset.pattern.permute.xlu0 %v1499_v50 }
 0x425   :  { %1441 = vset.pattern.permute.xlu2 %v1499_v50  ;;  %1440 = vset.pattern.permute.xlu1 %v1499_v50 }
 0x467   :  { %v1160_v8 = vpop.permute.xlu2 %1159 }
 0x468   :  { %v1170_v56 = vsub.f32 %v1578_v26, %v1160_v8 }
 0x469   :  { %v1158_v29 = vpop.permute.xlu0 %1157 }
 0x46a   :  { %v1169_v31 = vsub.f32 %v1590_v33, %v1158_v29  ;;  %1208 = vperm.xlu2 %1441, %v1170_v56  }
 0x46c   :  { %1203 = vperm.xlu1 %1440, %v1169_v31  }
 0x46f   :  { %v1176_v3 = vpop.permute.xlu2 %1175 }
 0x470   :  { %v1193_v54 = vmul.f32 %v1176_v3, %v1820_v48 }
 0x477   :  { %v1191_v34 = vpop.permute.xlu2 %1190 }
 0x478   :  { %v1200_v59 = vmul.f32 %v1191_v34, %v1858_v40 }
 0x481   :  { %v1164_v38 = vpop.permute.xlu0 %1163 }
 0x482   :  { %v1172_v55 = vsub.f32 %v1603_v37, %v1164_v38 }
 0x484   :  { %1218 = vperm.xlu1 %1440, %v1172_v55  }
 0x487   :  { %v1162_v6 = vpop.permute.xlu1 %1161 }
 0x488   :  { %v1171_v32 = vsub.f32 %v1624_v57, %v1162_v6  ;;  %v1194_v57 = vmul.f32 %v1176_v3, %v1815_v30 }
 0x489   :  { %v1181_v36 = vpop.permute.xlu0 %1180 }
 0x48a   :  { %1213 = vperm.xlu0 %1442, %v1171_v32   ;;  %v1195_v58 = vmul.f32 %v1181_v36, %v1834_v7  ;;  %v1196_v26 = vmul.f32 %v1181_v36, %v1828_v18  ;;  %v1199_v18 = vmul.f32 %v1191_v34, %v1865_v47 }
 0x48f   :  { %v1186_v37 = vpop.permute.xlu1 %1185 }
 0x490   :  { %v1197_v48 = vmul.f32 %v1186_v37, %v1853_v13  ;;  %v1198_v30 = vmul.f32 %v1186_v37, %v1843_v27 }
 0x4c4   :  { %v1209_v10 = vpop.permute.xlu2 %1208 }
 0x4c5   :  { %v1223_v11 = vadd.f32 %v1209_v10, %v1195_v58  ;;  %v1224_v33 = vadd.f32 %v1209_v10, %v1196_v26 }
 0x4c7   :  { %v1231_v39 = vmax.f32 %v1223_v11, 0.0  ;;  %v1232_v42 = vmax.f32 %v1224_v33, 0.0 }
 0x4c9   :  { %1239 = vst [vmem:[#allocation3 + $0x10] sm:$0xff] %v1231_v39 }
 0x4ca   :  { %1240 = vst.msk [vmem:[#allocation3 + $0x18] sm:$0xff] %vm124_vm1, %v1232_v42 }
 0x4de   :  { %v1204_v14 = vpop.permute.xlu1 %1203 }
 0x4df   :  { %v1221_v41 = vadd.f32 %v1204_v14, %v1193_v54  ;;  %v1222_v43 = vadd.f32 %v1204_v14, %v1194_v57 }
 0x4e1   :  { %v1229_v61 = vmax.f32 %v1221_v41, 0.0  ;;  %v1230_v7 = vmax.f32 %v1222_v43, 0.0 }
 0x4e3   :  { %1237 = vst [vmem:[#allocation3] sm:$0xff] %v1229_v61 }
 0x4e4   :  { %1238 = vst.msk [vmem:[#allocation3 + $0x8] sm:$0xff] %vm124_vm1, %v1230_v7 }
 0x4f6   :  { %v1219_v17 = vpop.permute.xlu1 %1218 }
 0x4f7   :  { %v1227_v9 = vadd.f32 %v1219_v17, %v1199_v18  ;;  %v1228_v60 = vadd.f32 %v1219_v17, %v1200_v59 }
 0x4f9   :  { %v1235_v62 = vmax.f32 %v1227_v9, 0.0  ;;  %v1236_v49 = vmax.f32 %v1228_v60, 0.0 }
 0x4fb   :  { %1243 = vst [vmem:[#allocation3 + $0x30] sm:$0xff] %v1235_v62 }
 0x4fc   :  { %1244 = vst.msk [vmem:[#allocation3 + $0x38] sm:$0xff] %vm124_vm1, %v1236_v49  ;;  %v1214_v22 = vpop.permute.xlu0 %1213 }
 0x4fd   :  { %v1225_v40 = vadd.f32 %v1214_v22, %v1197_v48  ;;  %v1226_v47 = vadd.f32 %v1214_v22, %v1198_v30 }
 0x4ff   :  { %v1233_v1 = vmax.f32 %v1225_v40, 0.0  ;;  %v1234_v12 = vmax.f32 %v1226_v47, 0.0 }
 0x501   :  { %1241 = vst [vmem:[#allocation3 + $0x20] sm:$0xff] %v1233_v1 }
 0x502   :  { %1242 = vst.msk [vmem:[#allocation3 + $0x28] sm:$0xff] %vm124_vm1, %v1234_v12 }
 0x503   :  { %1257 = dma.vmem_to_hbm [thread:$0]  %s1250_s0, 1024, %s1252_s29, [#allocation4], %s1501_s30, %s1501_s30, %s1502_s5  }
 0x504   :  { %1481 = dma.done.wait [#allocation4], 1024  }
 0x505   :  { %1482 = vsyncadd [#allocation4], 4294966272 }
 0x506   :  { %1262 = vsyncpa [#allocation4], 1 }

</bundles_post_ra>
